<compile_context>
chip_gen: v7x
topology: tpu7x:2x2x1
jax: 0.10.0
libtpu: 0.0.40
codegen_flags: <defaults>
</compile_context>

<pallas_src>
import functools

import jax
import jax.numpy as jnp
import numpy as np
from jax import lax
from jax.experimental import pallas as pl
from jax.experimental.pallas import tpu as pltpu


# ----------------------------------------------------------------------------
# Fused BN (pre-folded scale/shift) + 3x3 conv (single bf16 matmul) + LeakyReLU
# ----------------------------------------------------------------------------
def _block2d_kernel(x_ref, scale_ref, shift_ref, w_ref, mask_ref, o_ref,
                    im2col_ref, *, bt, c_in, c_out, hw, kh, kw, pad, width,
                    slope):
    # Shapes per grid step:
    #   x_ref:      (bt, Cin, HW)      f32
    #   scale_ref:  (1, Cin, 1)        f32   gamma / sqrt(var+eps)
    #   shift_ref:  (1, Cin, 1)        f32   beta - mean*scale
    #   w_ref:      (Cout, kh*kw*Cin)  bf16  K ordered (dy, dx, ci), resident
    #   mask_ref:   (kh*kw, 1, HW)     f32   zero-padding mask per tap, resident
    #   o_ref:      (bt, Cout, HW)     f32
    #   im2col_ref: (kh*kw*Cin, bt*HW) bf16  VMEM scratch, fully overwritten.

    # BatchNorm folded into one per-channel FMA over the whole image tile (f32).
    xb = x_ref[...] * scale_ref[...] + shift_ref[...]          # (bt, Cin, HW)

    # im2col: tap (dy, dx) is xb spatially shifted by (dy-pad, dx-pad) with
    # out-of-range positions zeroed (== Conv2d zero padding applied after BN).
    # The roll is batched over (bt, Cin); lane wrap-around positions coincide
    # with masked padding positions, so the mask makes them exact zeros.
    for dy in range(kh):
        for dx in range(kw):
            t = dy * kw + dx
            s = (dy - pad) * width + (dx - pad)     # flattened spatial shift
            sh = (-s) % hw
            rolled = pltpu.roll(xb, sh, axis=2) if sh != 0 else xb
            tap = rolled if (dy == pad and dx == pad) else rolled * mask_ref[t]
            tap16 = tap.astype(jnp.bfloat16)        # cast once, at the write
            for b in range(bt):                     # static, lane-aligned
                im2col_ref[t * c_in:(t + 1) * c_in,
                           b * hw:(b + 1) * hw] = tap16[b]

    # ONE fused MXU matmul over the whole image tile (bf16 in, f32 accumulate).
    res = jnp.dot(w_ref[...], im2col_ref[...],
                  preferred_element_type=jnp.float32)          # (Cout, bt*HW)

    # LeakyReLU(slope) + per-image stores (static lane-aligned slices).
    for b in range(bt):
        acc = res[:, b * hw:(b + 1) * hw]                      # (Cout, HW)
        o_ref[b] = jnp.maximum(acc, slope * acc).astype(o_ref.dtype)


def _pick_batch_tile(n, c_in, c_out, hw, n_taps):
    """Largest per-step image count whose FULL VMEM footprint (double-buffered
    in/out blocks + resident consts + bf16 im2col scratch) fits a per-core
    budget, while leaving >= min(n, 4) grid steps so both v7x TensorCores get
    parallel work and BlockSpec double-buffering has something to overlap."""
    try:
        vmem_cap = pltpu.get_tpu_info().vmem_capacity_bytes
    except Exception:                       # interpret mode / older runtimes
        vmem_cap = 64 << 20                 # v7x per-TC VMEM (smallest gen)
    budget = vmem_cap // 2                  # headroom for compiler temporaries

    k = n_taps * c_in
    resident = (c_out * k * 2               # bf16 weights
                + n_taps * hw * 4           # f32 padding masks
                + 2 * c_in * 4)             # scale / shift
    min_steps = min(n, 4)

    best = 1
    for bt in range(1, min(n, 8) + 1):
        if n % bt or (n // bt) < min_steps:
            continue
        blocks = 2 * bt * hw * 4 * (c_in + c_out)   # double-buffered in + out
        scratch = k * bt * hw * 2                   # bf16 im2col slab
        if resident + blocks + scratch <= budget:
            best = bt

    footprint = (resident + 2 * best * hw * 4 * (c_in + c_out)
                 + k * best * hw * 2)
    vmem_limit = int(min(vmem_cap * 3 // 4, max(32 << 20, 2 * footprint)))
    return best, vmem_limit


# ----------------------------------------------------------------------------
# Wrapper
# ----------------------------------------------------------------------------
@functools.partial(jax.jit, static_argnames=("eps", "slope", "pad"))
def block2d_forward(x_nchw, gamma, beta, w_oihw, *, eps=1e-5, slope=0.1, pad=1):
    N, c_in, H, W = x_nchw.shape
    c_out, _, kh, kw = w_oihw.shape
    HW = H * W
    n_taps = kh * kw
    K = n_taps * c_in

    x32 = x_nchw.astype(jnp.float32)

    # BatchNorm2d (training mode) batch statistics in ONE pass over x:
    # mean and E[x^2] are sibling reductions that XLA fuses into a single read.
    m1 = jnp.mean(x32, axis=(0, 2, 3))
    m2 = jnp.mean(x32 * x32, axis=(0, 2, 3))
    var = jnp.maximum(m2 - m1 * m1, 0.0)            # biased var (BN training)
    scale = gamma.astype(jnp.float32) / jnp.sqrt(var + eps)
    shift = beta.astype(jnp.float32) - m1 * scale

    # Keep NCHW; just flatten H*W onto the lane dimension (free reshape).
    x_flat = x32.reshape(N, c_in, HW)

    # Conv weights OIHW -> (Cout, kh*kw*Cin) with K ordered (dy, dx, ci);
    # cast to bf16 for the MXU (accumulation stays f32).
    w_flat = jnp.transpose(w_oihw.astype(jnp.float32),
                           (0, 2, 3, 1)).reshape(c_out, K).astype(jnp.bfloat16)

    # Zero-padding masks per tap (trace-time constants, tiny, kept resident).
    hh, ww = np.meshgrid(np.arange(H), np.arange(W), indexing="ij")
    masks_np = np.stack([
        (((hh + dy - pad) >= 0) & ((hh + dy - pad) < H) &
         ((ww + dx - pad) >= 0) & ((ww + dx - pad) < W))
        .astype(np.float32).reshape(HW)
        for dy in range(kh) for dx in range(kw)
    ]).reshape(n_taps, 1, HW)
    masks = jnp.asarray(masks_np)

    bt, vmem_limit = _pick_batch_tile(N, c_in, c_out, HW, n_taps)
    kernel = functools.partial(_block2d_kernel, bt=bt, c_in=c_in, c_out=c_out,
                               hw=HW, kh=kh, kw=kw, pad=pad, width=W,
                               slope=slope)

    y_flat = pl.pallas_call(
        kernel,
        grid=(N // bt,),
        in_specs=[
            pl.BlockSpec((bt, c_in, HW), lambda b: (b, 0, 0)),
            pl.BlockSpec((1, c_in, 1), lambda b: (0, 0, 0)),
            pl.BlockSpec((1, c_in, 1), lambda b: (0, 0, 0)),
            pl.BlockSpec((c_out, K), lambda b: (0, 0)),
            pl.BlockSpec((n_taps, 1, HW), lambda b: (0, 0, 0)),
        ],
        out_specs=pl.BlockSpec((bt, c_out, HW), lambda b: (b, 0, 0)),
        out_shape=jax.ShapeDtypeStruct((N, c_out, HW), jnp.float32),
        scratch_shapes=[pltpu.VMEM((K, bt * HW), jnp.bfloat16)],
        compiler_params=pltpu.CompilerParams(
            dimension_semantics=("parallel",),
            vmem_limit_bytes=vmem_limit),
    )(x_flat, scale.reshape(1, c_in, 1), shift.reshape(1, c_in, 1),
      w_flat, masks)

    # TODO(synk): emit bf16 output when the consumer accepts it (halves the
    #             largest HBM stream); kept f32 here to match the reference.
    return y_flat.reshape(N, c_out, H, W)


# ----------------------------------------------------------------------------
# Pure-JAX reference (f32 everywhere) for correctness check
# ----------------------------------------------------------------------------
def block2d_reference(x_nchw, gamma, beta, w_oihw, *, eps=1e-5, slope=0.1):
    x = x_nchw.astype(jnp.float32)
    mean = jnp.mean(x, axis=(0, 2, 3), keepdims=True)
    var = jnp.mean((x - mean) ** 2, axis=(0, 2, 3), keepdims=True)
    xn = (x - mean) / jnp.sqrt(var + eps)
    xn = xn * gamma.reshape(1, -1, 1, 1) + beta.reshape(1, -1, 1, 1)
    y = lax.conv_general_dilated(
        xn, w_oihw.astype(jnp.float32),
        window_strides=(1, 1), padding=((1, 1), (1, 1)),
        dimension_numbers=("NCHW", "OIHW", "NCHW"))
    return jnp.where(y > 0, y, slope * y)


if __name__ == "__main__":
    key = jax.random.PRNGKey(0)
    k_x, k_w, k_g, k_b = jax.random.split(key, 4)

    N, CIN, COUT, H, W = 2, 4, 8, 16, 16

    x = jax.random.normal(k_x, (N, CIN, H, W), dtype=jnp.float32)
    fan_in = CIN * 3 * 3
    w_conv = jax.random.uniform(k_w, (COUT, CIN, 3, 3), dtype=jnp.float32,
                                minval=-1.0, maxval=1.0) / np.sqrt(fan_in)
    gamma = 1.0 + 0.2 * jax.random.normal(k_g, (CIN,), dtype=jnp.float32)
    beta = 0.1 * jax.random.normal(k_b, (CIN,), dtype=jnp.float32)

    out = jax.block_until_ready(block2d_forward(x, gamma, beta, w_conv))
    ref = jax.block_until_ready(block2d_reference(x, gamma, beta, w_conv))

    assert out.shape == (N, COUT, H, W), out.shape
    # Tolerance reflects bf16 matmul inputs (f32 accumulation) vs f32 reference.
    np.testing.assert_allclose(np.asarray(out), np.asarray(ref),
                               rtol=2e-2, atol=5e-2)

    print("KERNEL_OK")
</pallas_src>

<mosaic_0001>
module attributes {stable_mosaic.version = 11 : i64} {
  func.func @_block2d_kernel(%arg0: i32, %arg1: memref<1x4x256xf32, #tpu.memory_space<vmem>>, %arg2: memref<1x4x1xf32, #tpu.memory_space<vmem>>, %arg3: memref<1x4x1xf32, #tpu.memory_space<vmem>>, %arg4: memref<8x36xbf16, #tpu.memory_space<vmem>>, %arg5: memref<9x1x256xf32, #tpu.memory_space<vmem>>, %arg6: memref<1x8x256xf32, #tpu.memory_space<vmem>>, %arg7: memref<36x256xbf16, #tpu.memory_space<vmem>>) attributes {dimension_semantics = [#tpu.dimension_semantics<parallel>], iteration_bounds = array<i64: 2>, scalar_prefetch = 0 : i64, scratch_operands = 1 : i64, tpu.core_type = #tpu.core_type<tc>, window_params = [{transform_indices = @transform_0, window_bounds = array<i64: 1, 4, 256>}, {pipeline_mode = #tpu.pipeline_mode<synchronous>, transform_indices = @transform_1, window_bounds = array<i64: 1, 4, 1>}, {pipeline_mode = #tpu.pipeline_mode<synchronous>, transform_indices = @transform_2, window_bounds = array<i64: 1, 4, 1>}, {pipeline_mode = #tpu.pipeline_mode<synchronous>, transform_indices = @transform_3, window_bounds = array<i64: 8, 36>}, {pipeline_mode = #tpu.pipeline_mode<synchronous>, transform_indices = @transform_4, window_bounds = array<i64: 9, 1, 256>}, {transform_indices = @transform_5, window_bounds = array<i64: 1, 8, 256>}]} {
    %c0 = arith.constant 0 : index
    %c0_0 = arith.constant 0 : index
    %c0_1 = arith.constant 0 : index
    %0 = vector.load %arg1[%c0, %c0_0, %c0_1] : memref<1x4x256xf32, #tpu.memory_space<vmem>>, vector<1x4x256xf32>
    %c0_2 = arith.constant 0 : index
    %c0_3 = arith.constant 0 : index
    %c0_4 = arith.constant 0 : index
    %1 = vector.load %arg2[%c0_2, %c0_3, %c0_4] : memref<1x4x1xf32, #tpu.memory_space<vmem>>, vector<1x4x1xf32>
    %2 = vector.broadcast %1 : vector<1x4x1xf32> to vector<1x4x256xf32>
    %3 = arith.mulf %0, %2 : vector<1x4x256xf32>
    %c0_5 = arith.constant 0 : index
    %c0_6 = arith.constant 0 : index
    %c0_7 = arith.constant 0 : index
    %4 = vector.load %arg3[%c0_5, %c0_6, %c0_7] : memref<1x4x1xf32, #tpu.memory_space<vmem>>, vector<1x4x1xf32>
    %5 = vector.broadcast %4 : vector<1x4x1xf32> to vector<1x4x256xf32>
    %6 = arith.addf %3, %5 : vector<1x4x256xf32>
    %c17_i32 = arith.constant 17 : i32
    %7 = tpu.dynamic_rotate %6 by %c17_i32 dim 2 : vector<1x4x256xf32>, i32 -> vector<1x4x256xf32>
    %c0_8 = arith.constant 0 : index
    %c0_9 = arith.constant 0 : index
    %c0_10 = arith.constant 0 : index
    %8 = vector.load %arg5[%c0_8, %c0_9, %c0_10] : memref<9x1x256xf32, #tpu.memory_space<vmem>>, vector<1x1x256xf32>
    %9 = vector.shape_cast %8 : vector<1x1x256xf32> to vector<1x256xf32>
    %10 = vector.shape_cast %9 : vector<1x256xf32> to vector<1x1x256xf32>
    %11 = vector.broadcast %10 : vector<1x1x256xf32> to vector<1x4x256xf32>
    %12 = arith.mulf %7, %11 : vector<1x4x256xf32>
    %13 = arith.truncf %12 : vector<1x4x256xf32> to vector<1x4x256xbf16>
    %14 = vector.shape_cast %13 : vector<1x4x256xbf16> to vector<4x256xbf16>
    %c0_11 = arith.constant 0 : index
    %c0_12 = arith.constant 0 : index
    %15 = vector.load %arg7[%c0_11, %c0_12] : memref<36x256xbf16, #tpu.memory_space<vmem>>, vector<4x256xbf16>
    tpu.vector_store %arg7[%c0_11, %c0_12], %14 {strides = array<i32>} : memref<36x256xbf16, #tpu.memory_space<vmem>>, vector<4x256xbf16>,
    %c16_i32 = arith.constant 16 : i32
    %16 = tpu.dynamic_rotate %6 by %c16_i32 dim 2 : vector<1x4x256xf32>, i32 -> vector<1x4x256xf32>
    %c1 = arith.constant 1 : index
    %c0_13 = arith.constant 0 : index
    %c0_14 = arith.constant 0 : index
    %17 = vector.load %arg5[%c1, %c0_13, %c0_14] : memref<9x1x256xf32, #tpu.memory_space<vmem>>, vector<1x1x256xf32>
    %18 = vector.shape_cast %17 : vector<1x1x256xf32> to vector<1x256xf32>
    %19 = vector.shape_cast %18 : vector<1x256xf32> to vector<1x1x256xf32>
    %20 = vector.broadcast %19 : vector<1x1x256xf32> to vector<1x4x256xf32>
    %21 = arith.mulf %16, %20 : vector<1x4x256xf32>
    %22 = arith.truncf %21 : vector<1x4x256xf32> to vector<1x4x256xbf16>
    %23 = vector.shape_cast %22 : vector<1x4x256xbf16> to vector<4x256xbf16>
    %c4 = arith.constant 4 : index
    %c0_15 = arith.constant 0 : index
    %24 = vector.load %arg7[%c4, %c0_15] : memref<36x256xbf16, #tpu.memory_space<vmem>>, vector<4x256xbf16>
    tpu.vector_store %arg7[%c4, %c0_15], %23 {strides = array<i32>} : memref<36x256xbf16, #tpu.memory_space<vmem>>, vector<4x256xbf16>,
    %c15_i32 = arith.constant 15 : i32
    %25 = tpu.dynamic_rotate %6 by %c15_i32 dim 2 : vector<1x4x256xf32>, i32 -> vector<1x4x256xf32>
    %c2 = arith.constant 2 : index
    %c0_16 = arith.constant 0 : index
    %c0_17 = arith.constant 0 : index
    %26 = vector.load %arg5[%c2, %c0_16, %c0_17] : memref<9x1x256xf32, #tpu.memory_space<vmem>>, vector<1x1x256xf32>
    %27 = vector.shape_cast %26 : vector<1x1x256xf32> to vector<1x256xf32>
    %28 = vector.shape_cast %27 : vector<1x256xf32> to vector<1x1x256xf32>
    %29 = vector.broadcast %28 : vector<1x1x256xf32> to vector<1x4x256xf32>
    %30 = arith.mulf %25, %29 : vector<1x4x256xf32>
    %31 = arith.truncf %30 : vector<1x4x256xf32> to vector<1x4x256xbf16>
    %32 = vector.shape_cast %31 : vector<1x4x256xbf16> to vector<4x256xbf16>
    %c8 = arith.constant 8 : index
    %c0_18 = arith.constant 0 : index
    %33 = vector.load %arg7[%c8, %c0_18] : memref<36x256xbf16, #tpu.memory_space<vmem>>, vector<4x256xbf16>
    tpu.vector_store %arg7[%c8, %c0_18], %32 {strides = array<i32>} : memref<36x256xbf16, #tpu.memory_space<vmem>>, vector<4x256xbf16>,
    %c1_i32 = arith.constant 1 : i32
    %34 = tpu.dynamic_rotate %6 by %c1_i32 dim 2 : vector<1x4x256xf32>, i32 -> vector<1x4x256xf32>
    %c3 = arith.constant 3 : index
    %c0_19 = arith.constant 0 : index
    %c0_20 = arith.constant 0 : index
    %35 = vector.load %arg5[%c3, %c0_19, %c0_20] : memref<9x1x256xf32, #tpu.memory_space<vmem>>, vector<1x1x256xf32>
    %36 = vector.shape_cast %35 : vector<1x1x256xf32> to vector<1x256xf32>
    %37 = vector.shape_cast %36 : vector<1x256xf32> to vector<1x1x256xf32>
    %38 = vector.broadcast %37 : vector<1x1x256xf32> to vector<1x4x256xf32>
    %39 = arith.mulf %34, %38 : vector<1x4x256xf32>
    %40 = arith.truncf %39 : vector<1x4x256xf32> to vector<1x4x256xbf16>
    %41 = vector.shape_cast %40 : vector<1x4x256xbf16> to vector<4x256xbf16>
    %c12 = arith.constant 12 : index
    %c0_21 = arith.constant 0 : index
    %42 = vector.load %arg7[%c12, %c0_21] : memref<36x256xbf16, #tpu.memory_space<vmem>>, vector<4x256xbf16>
    tpu.vector_store %arg7[%c12, %c0_21], %41 {strides = array<i32>} : memref<36x256xbf16, #tpu.memory_space<vmem>>, vector<4x256xbf16>,
    %43 = arith.truncf %6 : vector<1x4x256xf32> to vector<1x4x256xbf16>
    %44 = vector.shape_cast %43 : vector<1x4x256xbf16> to vector<4x256xbf16>
    %c16 = arith.constant 16 : index
    %c0_22 = arith.constant 0 : index
    %45 = vector.load %arg7[%c16, %c0_22] : memref<36x256xbf16, #tpu.memory_space<vmem>>, vector<4x256xbf16>
    tpu.vector_store %arg7[%c16, %c0_22], %44 {strides = array<i32>} : memref<36x256xbf16, #tpu.memory_space<vmem>>, vector<4x256xbf16>,
    %c255_i32 = arith.constant 255 : i32
    %46 = tpu.dynamic_rotate %6 by %c255_i32 dim 2 : vector<1x4x256xf32>, i32 -> vector<1x4x256xf32>
    %c5 = arith.constant 5 : index
    %c0_23 = arith.constant 0 : index
    %c0_24 = arith.constant 0 : index
    %47 = vector.load %arg5[%c5, %c0_23, %c0_24] : memref<9x1x256xf32, #tpu.memory_space<vmem>>, vector<1x1x256xf32>
    %48 = vector.shape_cast %47 : vector<1x1x256xf32> to vector<1x256xf32>
    %49 = vector.shape_cast %48 : vector<1x256xf32> to vector<1x1x256xf32>
    %50 = vector.broadcast %49 : vector<1x1x256xf32> to vector<1x4x256xf32>
    %51 = arith.mulf %46, %50 : vector<1x4x256xf32>
    %52 = arith.truncf %51 : vector<1x4x256xf32> to vector<1x4x256xbf16>
    %53 = vector.shape_cast %52 : vector<1x4x256xbf16> to vector<4x256xbf16>
    %c20 = arith.constant 20 : index
    %c0_25 = arith.constant 0 : index
    %54 = vector.load %arg7[%c20, %c0_25] : memref<36x256xbf16, #tpu.memory_space<vmem>>, vector<4x256xbf16>
    tpu.vector_store %arg7[%c20, %c0_25], %53 {strides = array<i32>} : memref<36x256xbf16, #tpu.memory_space<vmem>>, vector<4x256xbf16>,
    %c241_i32 = arith.constant 241 : i32
    %55 = tpu.dynamic_rotate %6 by %c241_i32 dim 2 : vector<1x4x256xf32>, i32 -> vector<1x4x256xf32>
    %c6 = arith.constant 6 : index
    %c0_26 = arith.constant 0 : index
    %c0_27 = arith.constant 0 : index
    %56 = vector.load %arg5[%c6, %c0_26, %c0_27] : memref<9x1x256xf32, #tpu.memory_space<vmem>>, vector<1x1x256xf32>
    %57 = vector.shape_cast %56 : vector<1x1x256xf32> to vector<1x256xf32>
    %58 = vector.shape_cast %57 : vector<1x256xf32> to vector<1x1x256xf32>
    %59 = vector.broadcast %58 : vector<1x1x256xf32> to vector<1x4x256xf32>
    %60 = arith.mulf %55, %59 : vector<1x4x256xf32>
    %61 = arith.truncf %60 : vector<1x4x256xf32> to vector<1x4x256xbf16>
    %62 = vector.shape_cast %61 : vector<1x4x256xbf16> to vector<4x256xbf16>
    %c24 = arith.constant 24 : index
    %c0_28 = arith.constant 0 : index
    %63 = vector.load %arg7[%c24, %c0_28] : memref<36x256xbf16, #tpu.memory_space<vmem>>, vector<4x256xbf16>
    tpu.vector_store %arg7[%c24, %c0_28], %62 {strides = array<i32>} : memref<36x256xbf16, #tpu.memory_space<vmem>>, vector<4x256xbf16>,
    %c240_i32 = arith.constant 240 : i32
    %64 = tpu.dynamic_rotate %6 by %c240_i32 dim 2 : vector<1x4x256xf32>, i32 -> vector<1x4x256xf32>
    %c7 = arith.constant 7 : index
    %c0_29 = arith.constant 0 : index
    %c0_30 = arith.constant 0 : index
    %65 = vector.load %arg5[%c7, %c0_29, %c0_30] : memref<9x1x256xf32, #tpu.memory_space<vmem>>, vector<1x1x256xf32>
    %66 = vector.shape_cast %65 : vector<1x1x256xf32> to vector<1x256xf32>
    %67 = vector.shape_cast %66 : vector<1x256xf32> to vector<1x1x256xf32>
    %68 = vector.broadcast %67 : vector<1x1x256xf32> to vector<1x4x256xf32>
    %69 = arith.mulf %64, %68 : vector<1x4x256xf32>
    %70 = arith.truncf %69 : vector<1x4x256xf32> to vector<1x4x256xbf16>
    %71 = vector.shape_cast %70 : vector<1x4x256xbf16> to vector<4x256xbf16>
    %c28 = arith.constant 28 : index
    %c0_31 = arith.constant 0 : index
    %72 = vector.load %arg7[%c28, %c0_31] : memref<36x256xbf16, #tpu.memory_space<vmem>>, vector<4x256xbf16>
    tpu.vector_store %arg7[%c28, %c0_31], %71 {strides = array<i32>} : memref<36x256xbf16, #tpu.memory_space<vmem>>, vector<4x256xbf16>,
    %c239_i32 = arith.constant 239 : i32
    %73 = tpu.dynamic_rotate %6 by %c239_i32 dim 2 : vector<1x4x256xf32>, i32 -> vector<1x4x256xf32>
    %c8_32 = arith.constant 8 : index
    %c0_33 = arith.constant 0 : index
    %c0_34 = arith.constant 0 : index
    %74 = vector.load %arg5[%c8_32, %c0_33, %c0_34] : memref<9x1x256xf32, #tpu.memory_space<vmem>>, vector<1x1x256xf32>
    %75 = vector.shape_cast %74 : vector<1x1x256xf32> to vector<1x256xf32>
    %76 = vector.shape_cast %75 : vector<1x256xf32> to vector<1x1x256xf32>
    %77 = vector.broadcast %76 : vector<1x1x256xf32> to vector<1x4x256xf32>
    %78 = arith.mulf %73, %77 : vector<1x4x256xf32>
    %79 = arith.truncf %78 : vector<1x4x256xf32> to vector<1x4x256xbf16>
    %80 = vector.shape_cast %79 : vector<1x4x256xbf16> to vector<4x256xbf16>
    %c32 = arith.constant 32 : index
    %c0_35 = arith.constant 0 : index
    %81 = vector.load %arg7[%c32, %c0_35] : memref<36x256xbf16, #tpu.memory_space<vmem>>, vector<4x256xbf16>
    tpu.vector_store %arg7[%c32, %c0_35], %80 {strides = array<i32>} : memref<36x256xbf16, #tpu.memory_space<vmem>>, vector<4x256xbf16>,
    %c0_36 = arith.constant 0 : index
    %c0_37 = arith.constant 0 : index
    %82 = vector.load %arg4[%c0_36, %c0_37] : memref<8x36xbf16, #tpu.memory_space<vmem>>, vector<8x36xbf16>
    %c0_38 = arith.constant 0 : index
    %c0_39 = arith.constant 0 : index
    %83 = vector.load %arg7[%c0_38, %c0_39] : memref<36x256xbf16, #tpu.memory_space<vmem>>, vector<36x256xbf16>
    %cst = arith.constant dense<0.000000e+00> : vector<8x256xf32>
    %84 = tpu.matmul %82, %83, %cst {dimension_numbers = #tpu.dot_dimension_numbers<[1], [0], [0], [1], [0, 0, 1, 1], [], []>} : vector<8x36xbf16>, vector<36x256xbf16>, vector<8x256xf32> -> vector<8x256xf32>
    %cst_40 = arith.constant 1.000000e-01 : f32
    %85 = vector.broadcast %cst_40 : f32 to vector<8x256xf32>
    %86 = arith.mulf %85, %84 : vector<8x256xf32>
    %87 = arith.maximumf %84, %86 : vector<8x256xf32>
    %c0_41 = arith.constant 0 : index
    %c0_42 = arith.constant 0 : index
    %c0_43 = arith.constant 0 : index
    %88 = vector.load %arg6[%c0_41, %c0_42, %c0_43] : memref<1x8x256xf32, #tpu.memory_space<vmem>>, vector<1x8x256xf32>
    %89 = vector.shape_cast %88 : vector<1x8x256xf32> to vector<8x256xf32>
    %90 = vector.shape_cast %87 : vector<8x256xf32> to vector<1x8x256xf32>
    tpu.vector_store %arg6[%c0_41, %c0_42, %c0_43], %90 {strides = array<i32>} : memref<1x8x256xf32, #tpu.memory_space<vmem>>, vector<1x8x256xf32>,
    return
  }
  func.func @transform_0(%arg0: i32) -> (i32, i32, i32) {
    %c0_i32 = arith.constant 0 : i32
    %c0_i32_0 = arith.constant 0 : i32
    %c0_i32_1 = arith.constant 0 : i32
    return %arg0, %c0_i32, %c0_i32_0 : i32, i32, i32
  }
  func.func @transform_1(%arg0: i32) -> (i32, i32, i32) {
    %c0_i32 = arith.constant 0 : i32
    %c0_i32_0 = arith.constant 0 : i32
    %c0_i32_1 = arith.constant 0 : i32
    %c0_i32_2 = arith.constant 0 : i32
    return %c0_i32, %c0_i32_0, %c0_i32_1 : i32, i32, i32
  }
  func.func @transform_2(%arg0: i32) -> (i32, i32, i32) {
    %c0_i32 = arith.constant 0 : i32
    %c0_i32_0 = arith.constant 0 : i32
    %c0_i32_1 = arith.constant 0 : i32
    %c0_i32_2 = arith.constant 0 : i32
    return %c0_i32, %c0_i32_0, %c0_i32_1 : i32, i32, i32
  }
  func.func @transform_3(%arg0: i32) -> (i32, i32) {
    %c0_i32 = arith.constant 0 : i32
    %c0_i32_0 = arith.constant 0 : i32
    %c0_i32_1 = arith.constant 0 : i32
    return %c0_i32, %c0_i32_0 : i32, i32
  }
  func.func @transform_4(%arg0: i32) -> (i32, i32, i32) {
    %c0_i32 = arith.constant 0 : i32
    %c0_i32_0 = arith.constant 0 : i32
    %c0_i32_1 = arith.constant 0 : i32
    %c0_i32_2 = arith.constant 0 : i32
    return %c0_i32, %c0_i32_0, %c0_i32_1 : i32, i32, i32
  }
  func.func @transform_5(%arg0: i32) -> (i32, i32, i32) {
    %c0_i32 = arith.constant 0 : i32
    %c0_i32_0 = arith.constant 0 : i32
    %c0_i32_1 = arith.constant 0 : i32
    return %arg0, %c0_i32, %c0_i32_0 : i32, i32, i32
  }
}

</mosaic_0001>

<bundles_post_ra>
// kernel: block2d_forward.1
= control target key start
LH: loop header
LB: loop body
LE: loop exit
PB: predicated region body
PF: predicated region fallthrough
CT: control target
= control target key end

     0   :  { %s785_s18 = smov 0   ;;  %s869_s0 = inlined_call_operand.vmem [shape: f32[2,4,256], index: 0, kind: input, shape index: {}]   ;;  %s870_s1 = inlined_call_operand.vmem [shape: f32[1,4,1], index: 1, kind: input, shape index: {}]   ;;  %s871_s2 = inlined_call_operand.vmem [shape: f32[1,4,1], index: 2, kind: input, shape index: {}]   ;;  %s872_s3 = inlined_call_operand.vmem [shape: bf16[8,36], index: 3, kind: input, shape index: {}]   ;;  %s873_s4 = inlined_call_operand.vmem [shape: f32[9,1,256], index: 4, kind: input, shape index: {}]   ;;  %s874_s5 = inlined_call_operand.vmem [shape: f32[2,8,256], index: 5, kind: output, shape index: {}]  }
   0x1 LB: > { %s664_s19 = sadd.s32 4294967295, %s743_s18   ;;  %p668_p0 = scmp.ge.s32.totalorder %s743_s18, 1  ;;  %s743_s18 = sphi %s785_s18, %s15_s18  }
   0x2   : > { %p187_p1 = scmp.lt.s32.totalorder %s743_s18, 3 }
   0x4   : > { %p188_p2 = pnand %p668_p0, %p187_p1 }
   0x5   : > { %v227_v0 = vld [vmem:[%s870_s1] sm:$0xf] (!%p188_p2)  ;;  %v745_v1 = vmov (!%p188_p2), 0   ;;  %p215_p3 = scmp.lt.s32.totalorder (!%p188_p2), %s664_s19, 1  ;;  %v746_v3 = vmov (!%p188_p2), 839922192   ;;  %v235_v5 = vlaneseq (!%p188_p2) }
   0x6   : > { %191 = sbr.rel (%p188_p2) target bundleno = 527 (0x20f), region = 40  ;;  %728 = vset.pattern.permute.xlu0 (!%p188_p2), %v745_v1  ;;  %594 = vmatprep.mubr.bf16.mxu0 (!%p188_p2), %v745_v1  ;;  %v241_v2 = vld [vmem:[%s871_s2] sm:$0xf] (!%p188_p2)  ;;  %v233_v4 = vunpack.c.l.s4 (!%p188_p2), %v746_v3  ;;  %s747_s28 = smov (!%p188_p2), 1   ;;  %v678_v26 = vld [vmem:[%s873_s4 + $0x6] sm:$0x3] (!%p188_p2) }
   0x7   : > { %230 = vperm.xlu0 (!%p188_p2), %728, %v227_v0   ;;  %v236_v7 = vshrl.u32 (!%p188_p2), %v235_v5, 7  ;;  %s748_s29 = smov (!%p188_p2), 16   ;;  %s749_s30 = smov (!%p188_p2), 17   ;;  %v805_v18 = vand.u32 (!%p188_p2), 127, %v235_v5  ;;  %v674_v21 = vld [vmem:[%s873_s4 + $0x2] sm:$0x3] (!%p188_p2) }
   0x8   : > { %v234_v6 = vunpack.c.0.s8 (!%p188_p2), %v233_v4  ;;  %s750_s6 = smov (!%p188_p2), 15   ;;  %s751_s7 = smov (!%p188_p2), 127   ;;  %v267_v35 = vld [vmem:[%s873_s4] sm:$0x3] (!%p188_p2)  ;;  %v676_v46 = vld [vmem:[%s873_s4 + $0x4] sm:$0x3] (!%p188_p2) }
   0x9   : > { %s752_s8 = smov (!%p188_p2), 112   ;;  %s753_s9 = smov (!%p188_p2), 113   ;;  %v807_v19 = vsub.s32 (!%p188_p2), 0, %v236_v7  ;;  %v809_v20 = vsub.s32 (!%p188_p2), 1, %v236_v7  ;;  %vm294_vm0 = vcmp.lt.s32.totalorder (!%p188_p2), %v805_v18, 16  ;;  %vm357_vm1 = vcmp.lt.s32.totalorder (!%p188_p2), %v805_v18, 1 }
   0xa   : > { %v237_v8 = vsub.s32 (!%p188_p2), %v234_v6, %v236_v7  ;;  %s754_s10 = smov (!%p188_p2), 111   ;;  %vm264_vm2 = vcmp.lt.s32.totalorder (!%p188_p2), %v805_v18, 17  ;;  %vm326_vm3 = vcmp.lt.s32.totalorder (!%p188_p2), %v805_v18, 15  ;;  %v681_v57 = vld [vmem:[%s873_s4 + $0xa] sm:$0x3] (!%p188_p2)  ;;  %vm398_vm4 = vcmp.lt.s32.totalorder (!%p188_p2), %v805_v18, 127 }
   0xb   : > { %244 = vperm.xlu0 (!%p188_p2), %728, %v241_v2   ;;  %v303_v24 = vrot.slane (!%p188_p2), %v674_v21, %v807_v19  ;;  %v307_v25 = vrot.slane (!%p188_p2), %v674_v21, %v809_v20  ;;  %v366_v33 = vrot.slane (!%p188_p2), %v678_v26, %v807_v19  ;;  %v370_v34 = vrot.slane (!%p188_p2), %v678_v26, %v809_v20  ;;  %v685_v2 = vld [vmem:[%s873_s4 + $0xe] sm:$0x3] (!%p188_p2)  ;;  %v687_v26 = vld [vmem:[%s873_s4 + $0x10] sm:$0x3] (!%p188_p2) }
   0xc   : > { %v272_v41 = vrot.slane (!%p188_p2), %v267_v35, %v807_v19  ;;  %v276_v45 = vrot.slane (!%p188_p2), %v267_v35, %v809_v20  ;;  %v335_v51 = vrot.slane (!%p188_p2), %v676_v46, %v807_v19  ;;  %v339_v56 = vrot.slane (!%p188_p2), %v676_v46, %v809_v20 }
   0xd   : > { %s876_s19 = smov (!%p215_p3, %s664_s19), 1  ;;  %v407_v0 = vrot.slane %v681_v57, %v807_v19  ;;  %v411_v1 = vrot.slane %v681_v57, %v809_v20  ;;  %vm461_vm5 = vcmp.lt.s32.totalorder %v805_v18, 112  ;;  %vm430_vm6 = vcmp.lt.s32.totalorder %v805_v18, 113 }
   0xe   : > { %s699_s24 = sshll.u32 %s876_s19, 3  ;;  %vm493_vm7 = vcmp.lt.s32.totalorder %v805_v18, 111  ;;  %vm555_vm8 = vcmask 1041408   ;;  %vm551_vm9 = vcmask 293888  }
   0xf   : > { %s219_s27 = scalar_lea.vmem %s869_s0, %s699_s24 }
  0x10   : > { %v226_v11 = vld [vmem:[%s219_s27] sm:$0xff] }
  0x86   : > { %v231_v9 = vpop.permute.xlu0 %230 }
  0x87   : > { %v238_v10 = vrot.slane %v231_v9, %v237_v8 }
  0x89   : > { %v240_v13 = vmul.f32 %v238_v10, %v226_v11  ;;  %v470_v10 = vrot.slane %v685_v2, %v807_v19  ;;  %v474_v11 = vrot.slane %v685_v2, %v809_v20 }
  0x8a   : > { %v245_v12 = vpop.permute.xlu0 %244 }
  0x8b   : > { %v252_v14 = vrot.slane %v245_v12, %v237_v8  ;;  %v683_v12 = vld [vmem:[%s873_s4 + $0xc] sm:$0x3] }
  0x8d   : > { %v254_v15 = vadd.f32 %v252_v14, %v240_v13 }
  0x8f   : > { %353 = vrot.lane.b32.xlu0 %v254_v15, %s747_s28  ;;  %290 = vrot.lane.b32.xlu1 %v254_v15, %s748_s29  ;;  %v256_v16 = vcombine.high %v254_v15, %v254_v15 }
  0x91   : > { %v705_v17 = vpack.c.bf16 %v256_v16, %v254_v15 }
  0x93   : > { %258 = vrot.lane.b32.xlu0 %v254_v15, %s749_s30  ;;  %292 = vrot.lane.b32.xlu1 %v256_v16, %s748_s29  ;;  %393 = vst [vmem:[#allocation2 + $0x10] sm:$0x33] %v705_v17  ;;  %v439_v17 = vrot.slane %v683_v12, %v807_v19 }
  0x97   : > { %322 = vrot.lane.b32.xlu0 %v254_v15, %s750_s6  ;;  %355 = vrot.lane.b32.xlu1 %v256_v16, %s747_s28 }
  0x9b   : > { %394 = vrot.lane.b32.xlu0 %v254_v15, %s751_s7  ;;  %260 = vrot.lane.b32.xlu1 %v256_v16, %s749_s30 }
  0x9f   : > { %457 = vrot.lane.b32.xlu0 %v254_v15, %s752_s8  ;;  %324 = vrot.lane.b32.xlu1 %v256_v16, %s750_s6  ;;  %s700_s6 = sshll.u32 %s876_s19, 4 }
  0xa3   : > { %426 = vrot.lane.b32.xlu0 %v254_v15, %s753_s9  ;;  %396 = vrot.lane.b32.xlu1 %v256_v16, %s751_s7 }
  0xa7   : > { %489 = vrot.lane.b32.xlu0 %v254_v15, %s754_s10  ;;  %459 = vrot.lane.b32.xlu1 %v256_v16, %s752_s8 }
  0xab   : > { %428 = vrot.lane.b32.xlu1 %v256_v16, %s753_s9  ;;  %s224_s9 = scalar_lea.vmem %s874_s5, %s700_s6 }
  0xaf   : > { %491 = vrot.lane.b32.xlu1 %v256_v16, %s754_s10 }
 0x101   : > { %v354_v22 = vpop.permute.xlu0 %353  ;;  %v291_v23 = vpop.permute.xlu1 %290 }
 0x105   : > { %v259_v27 = vpop.permute.xlu0 %258  ;;  %v293_v28 = vpop.permute.xlu1 %292 }
 0x106   : > { %v295_v29 = vsel %vm294_vm0, %v291_v23, %v293_v28  ;;  %v296_v30 = vsel %vm294_vm0, %v293_v28, %v291_v23 }
 0x107   : > { %v310_v31 = vmul.f32 %v303_v24, %v296_v30  ;;  %v311_v32 = vmul.f32 %v307_v25, %v295_v29  ;;  %v443_v25 = vrot.slane %v683_v12, %v809_v20 }
 0x109   : > { %v702_v36 = vpack.c.bf16 %v311_v32, %v310_v31  ;;  %v323_v37 = vpop.permute.xlu0 %322  ;;  %v356_v38 = vpop.permute.xlu1 %355  ;;  %v502_v32 = vrot.slane %v687_v26, %v807_v19 }
 0x10a   : > { %v358_v39 = vsel %vm357_vm1, %v354_v22, %v356_v38  ;;  %v359_v40 = vsel %vm357_vm1, %v356_v38, %v354_v22 }
 0x10b   : > { %v319_v42 = vrot.slane %v702_v36, 6  ;;  %v373_v43 = vmul.f32 %v366_v33, %v359_v40  ;;  %v374_v44 = vmul.f32 %v370_v34, %v358_v39 }
 0x10d   : > { %321 = vst [vmem:[#allocation2] sm:$0xcc] %v319_v42  ;;  %v704_v47 = vpack.c.bf16 %v374_v44, %v373_v43  ;;  %v261_v48 = vpop.permute.xlu1 %260  ;;  %v395_v53 = vpop.permute.xlu0 %394 }
 0x10e   : > { %v265_v49 = vsel %vm264_vm2, %v259_v27, %v261_v48  ;;  %v266_v50 = vsel %vm264_vm2, %v261_v48, %v259_v27 }
 0x10f   : > { %v382_v52 = vrot.slane %v704_v47, 6  ;;  %v279_v54 = vmul.f32 %v272_v41, %v266_v50  ;;  %v280_v55 = vmul.f32 %v276_v45, %v265_v49  ;;  %v520_v49 = vld [vmem:[%s872_s3] sm:$0xf] }
 0x111   : > { %384 = vst [vmem:[#allocation2 + $0x8] sm:$0xcc] %v382_v52  ;;  %v701_v58 = vpack.c.bf16 %v280_v55, %v279_v54  ;;  %v325_v59 = vpop.permute.xlu1 %324  ;;  %v458_v3 = vpop.permute.xlu0 %457 }
 0x112   : > { %v327_v60 = vsel %vm326_vm3, %v323_v37, %v325_v59  ;;  %v328_v61 = vsel %vm326_vm3, %v325_v59, %v323_v37  ;;  %v506_v37 = vrot.slane %v687_v26, %v809_v20 }
 0x113   : > { %289 = vst [vmem:[#allocation2] sm:$0x33] %v701_v58  ;;  %v342_v62 = vmul.f32 %v335_v51, %v328_v61  ;;  %v343_v63 = vmul.f32 %v339_v56, %v327_v60 }
 0x115   : > { %v703_v4 = vpack.c.bf16 %v343_v63, %v342_v62  ;;  %v397_v5 = vpop.permute.xlu1 %396  ;;  %v427_v21 = vpop.permute.xlu0 %426 }
 0x116   : > { %v399_v6 = vsel %vm398_vm4, %v395_v53, %v397_v5  ;;  %v400_v7 = vsel %vm398_vm4, %v397_v5, %v395_v53 }
 0x117   : > { %352 = vst [vmem:[#allocation2 + $0x8] sm:$0x33] %v703_v4  ;;  %v414_v8 = vmul.f32 %v407_v0, %v399_v6  ;;  %v415_v9 = vmul.f32 %v411_v1, %v400_v7 }
 0x119   : > { %v706_v13 = vpack.c.bf16 %v415_v9, %v414_v8  ;;  %v460_v14 = vpop.permute.xlu1 %459  ;;  %v490_v38 = vpop.permute.xlu0 %489 }
 0x11a   : > { %v462_v15 = vsel %vm461_vm5, %v458_v3, %v460_v14  ;;  %v463_v16 = vsel %vm461_vm5, %v460_v14, %v458_v3 }
 0x11b   : > { %v423_v22 = vrot.slane %v706_v13, 6  ;;  %v477_v23 = vmul.f32 %v470_v10, %v462_v15  ;;  %v478_v24 = vmul.f32 %v474_v11, %v463_v16 }
 0x11d   : > { %425 = vst [vmem:[#allocation2 + $0x10] sm:$0xcc] %v423_v22  ;;  %v708_v27 = vpack.c.bf16 %v478_v24, %v477_v23  ;;  %v429_v28 = vpop.permute.xlu1 %428 }
 0x11e   : > { %v431_v29 = vsel %vm430_vm6, %v427_v21, %v429_v28  ;;  %v432_v30 = vsel %vm430_vm6, %v429_v28, %v427_v21  ;;  %v729_v31 = vld [vmem:[#allocation2 + $0x4] ss:$8 sps:$4 sm:$0xff]   ;;  %v731_v33 = vld [vmem:[#allocation2] ss:$8 sps:$4 sm:$0xff]  }
 0x11f   : > { %v486_v34 = vrot.slane %v708_v27, 6  ;;  %v446_v35 = vmul.f32 %v439_v17, %v431_v29  ;;  %v447_v36 = vmul.f32 %v443_v25, %v432_v30  ;;  %562 = vmatprep.subr.bf16.mxu0 %v729_v31 }
 0x120   : > { %563 = vmatpush1.bf16.msra.mxu0 %v731_v33 }
 0x121   : > { %488 = vst [vmem:[#allocation2 + $0x18] sm:$0xcc] %v486_v34  ;;  %v707_v39 = vpack.c.bf16 %v447_v36, %v446_v35  ;;  %v492_v40 = vpop.permute.xlu1 %491 }
 0x122   : > { %v494_v41 = vsel %vm493_vm7, %v490_v38, %v492_v40  ;;  %v495_v42 = vsel %vm493_vm7, %v492_v40, %v490_v38 }
 0x123   : > { %456 = vst [vmem:[#allocation2 + $0x18] sm:$0x33] %v707_v39  ;;  %v509_v43 = vmul.f32 %v502_v32, %v494_v41  ;;  %v510_v44 = vmul.f32 %v506_v37, %v495_v42 }
 0x125   : > { %v709_v18 = vpack.c.bf16 %v510_v44, %v509_v43 }
 0x127   : > { %519 = vst [vmem:[#allocation2 + $0x20] sm:$0x33] %v709_v18 }
 0x12a   : > { %v732_v19 = vld [vmem:[#allocation2 + $0x14] ss:$8 sps:$4 sm:$0xff]   ;;  %v734_v45 = vld [vmem:[#allocation2 + $0x10] ss:$8 sps:$4 sm:$0xff]  }
 0x12b   : > { %564 = vmatprep.subr.bf16.mxu0 %v732_v19 }
 0x12c   : > { %565 = vmatpush1.bf16.msra.mxu0 %v734_v45 }
 0x12e   : > { %v525_v46 = vld [vmem:[#allocation2 + $0x20] sm:$0x33] }
 0x12f   : > { %v694_v20 = vcombine.high %v525_v46, %v525_v46  ;;  %v693_v47 = vcombine.low %v525_v46, %v525_v46 }
 0x131   : > { %695 = vmatprep.subr.msk.bf16.mxu0 %vm555_vm8, %v694_v20  ;;  %v557_v48 = vsel %vm555_vm8, %v693_v47, 0 }
 0x132   : > { %567 = vmatpush1.bf16.msra.mxu0 %v557_v48 }
 0x135   : > { %696 = vmatmul.mubr.msk.bf16.vlgmr.msra.gmra.mrb[0].mxu0 %vm551_vm9, %v520_v49 }
 0x208   : > { %v596_v50 = vpop.f32.mrb[0].mxu0 }
 0x209   : > { %v603_v51 = vmul.f32 0.1, %v596_v50  ;;  %v598_v52 = vpop.f32.mrb[1].mxu0 }
 0x20a   : > { %v604_v53 = vmul.f32 0.1, %v598_v52  ;;  %v600_v54 = vpop.f32.mrb[2].mxu0 }
 0x20b   : > { %v605_v55 = vmax.f32 %v596_v50, %v603_v51  ;;  %v601_v56 = vpop.f32.mrb[3].mxu0 }
 0x20c   : > { %v606_v57 = vmax.f32 %v598_v52, %v604_v53 }
 0x20d   : > { %607 = vst [vmem:[%s224_s9] sm:$0xff] %v605_v55 }
 0x20e   : > { %608 = vst [vmem:[%s224_s9 + $0x8] sm:$0xff] %v606_v57 }
 0x20f PF: > { %s15_s18 = sadd.s32 1, %s743_s18  }
 0x210   : > { %p12_p4 = scmp.ge.s32.totalorder %s15_s18, 4  }
 0x212   :  { %14 = sbr.rel (!%p12_p4) target bundleno = 1 (0x1), region = 77 }

</bundles_post_ra>
